<compile_context>
chip_gen: v6e
topology: v6e:2x2x1
jax: 0.10.0
libtpu: 0.0.40
codegen_flags: <defaults>
</compile_context>

<pallas_src>
import functools

import jax
import jax.numpy as jnp
from jax.experimental import pallas as pl
from jax.experimental.pallas import tpu as pltpu


def _round_up(x, m):
    return (x + m - 1) // m * m


def _default_tanh_dtype():
    # bf16 EUP tanh exists on v6e / v7x; keep f32 on v5e and older (no bf16 EUP/VPU).
    try:
        kind = jax.devices()[0].device_kind.lower()
    except Exception:
        return jnp.float32
    if any(tag in kind for tag in ("v6", "v7", "7x")):
        return jnp.bfloat16
    return jnp.float32


def _per_row_vmem_bytes(S_pad, D, V_pad):
    # double-buffered bf16 pk+value, double-buffered f32 q/len/ctx/alphas,
    # f32 tanh intermediate, f32 broadcast-mul for context, softmax temporaries.
    return (2 * 2 * S_pad * (D + V_pad)
            + 2 * 4 * (D + V_pad + S_pad + 1)
            + 4 * S_pad * D
            + 4 * S_pad * V_pad
            + 4 * (2 * S_pad + V_pad))


def _pick_tb(B_pad, S_pad, D, V_pad, vmem_budget):
    per_row = _per_row_vmem_bytes(S_pad, D, V_pad)
    tb = int(vmem_budget // max(per_row, 1))
    tb = max(8, min(64, (tb // 8) * 8))
    tb = min(tb, B_pad)
    while B_pad % tb:
        tb -= 8
    # prefer >= 2 grid steps so both v7x TensorCores get work under "parallel"
    while tb > 8 and B_pad // tb < 2:
        tb -= 8
        while B_pad % tb:
            tb -= 8
    return tb


def _attn_kernel(len_ref, q_ref, pk_ref, v_ref, w_ref, *out_refs,
                 s_on_lanes, tanh_dtype, return_alphas):
    # len_ref : (TB, 1)            int32 valid lengths (>= 1 by wrapper invariant)
    # q_ref   : (TB, D) | (TB,D,1) f32   query (decoder state)
    # pk_ref  : (TB,S,D) | (TB,D,S) bf16 proj_key (zero padded along S)
    # v_ref   : (TB, S, Vp)        bf16  value (zero padded along S and V)
    # w_ref   : (1, D) | (D, 1)    f32   energy_layer weight (Linear(D,1,bias=False))
    ctx_ref = out_refs[0]
    alpha_ref = out_refs[1] if return_alphas else None

    pk = pk_ref[...]
    v = v_ref[...]
    w = w_ref[...]
    lens = len_ref[...]

    if s_on_lanes:
        # pk: (TB, D, S) — S on lanes (full 128-lane utilization for the tanh).
        x = q_ref[...].astype(tanh_dtype) + pk.astype(tanh_dtype)        # (TB, D, S)
        t = jnp.tanh(x)
        scores = jnp.sum(t.astype(jnp.float32) * w[None, :, :], axis=1)  # (TB, S)
    else:
        # pk: (TB, S, D) — D on lanes (short-sequence layout).
        x = q_ref[...][:, None, :].astype(tanh_dtype) + pk.astype(tanh_dtype)
        t = jnp.tanh(x)                                                   # (TB, S, D)
        scores = jnp.sum(t.astype(jnp.float32) * w[None, :, :], axis=-1)  # (TB, S)

    # Mask from lengths (also masks the S padding); large finite negative so a
    # (hypothetical) fully-masked row cannot poison with NaN — wrapper forces lens >= 1.
    pos = jax.lax.broadcasted_iota(jnp.int32, scores.shape, 1)
    scores = jnp.where(pos < lens, scores, -1e30)

    # softmax over the sequence (lane) axis
    smax = jnp.max(scores, axis=-1, keepdims=True)
    e = jnp.exp(scores - smax)
    denom = jnp.sum(e, axis=-1, keepdims=True)
    alphas = e * pl.reciprocal(denom, approx=True)                        # (TB, S) f32

    # context = sum_s alphas * value — VPU broadcast-mul + sublane reduce (MXU idle).
    # TODO(synk): if the bundle shows lane->sublane relayout here, switch to a batched
    # lax.dot_general contracting S.
    ctx = jnp.sum(alphas[:, :, None] * v, axis=1)                         # (TB, V) f32

    ctx_ref[...] = ctx.astype(ctx_ref.dtype)
    if return_alphas:
        alpha_ref[...] = alphas.astype(alpha_ref.dtype)


def prepare_attention_inputs(proj_key, value, lengths):
    """Once-per-sequence layout work (hoisted out of the per-step hot path):
    pad B/S/V, downcast the two big streams to bf16, and pick the pk layout."""
    B, S, D = proj_key.shape
    V = value.shape[-1]
    S_pad = _round_up(S, 128) if S >= 128 else _round_up(S, 8)
    V_pad = _round_up(V, 128)
    B_pad = _round_up(B, 8)
    s_on_lanes = (D < 128) and (S_pad % 128 == 0)

    if s_on_lanes:
        pk = jnp.zeros((B_pad, D, S_pad), jnp.bfloat16)
        pk = pk.at[:B, :, :S].set(jnp.swapaxes(proj_key, 1, 2).astype(jnp.bfloat16))
    else:
        pk = jnp.zeros((B_pad, S_pad, D), jnp.bfloat16)
        pk = pk.at[:B, :S, :].set(proj_key.astype(jnp.bfloat16))
    vv = jnp.zeros((B_pad, S_pad, V_pad), jnp.bfloat16)
    vv = vv.at[:B, :S, :V].set(value.astype(jnp.bfloat16))
    lens = jnp.full((B_pad, 1), 1, jnp.int32).at[:B, 0].set(lengths.astype(jnp.int32))
    meta = dict(B=B, S=S, D=D, V=V, B_pad=B_pad, S_pad=S_pad, V_pad=V_pad,
                s_on_lanes=s_on_lanes)
    return pk, vv, lens, meta


def bahdanau_attention_step(query, pk_pad, v_pad, lens_pad, energy_w, meta, *,
                            return_alphas=True, tanh_dtype=None, tb=None,
                            vmem_budget=20 << 20):
    """Per-decode-step hot path. query (B,1,D) f32, pre-prepared pk/value/lens.
    Returns context (B,1,V) f32 [and alphas (B,1,S) f32 if return_alphas]."""
    B, S, D, V = meta["B"], meta["S"], meta["D"], meta["V"]
    B_pad, S_pad, V_pad = meta["B_pad"], meta["S_pad"], meta["V_pad"]
    s_on_lanes = meta["s_on_lanes"]

    if tanh_dtype is None:
        tanh_dtype = _default_tanh_dtype()
    if tb is None:
        tb = _pick_tb(B_pad, S_pad, D, V_pad, vmem_budget)

    q_flat = query[:, 0, :].astype(jnp.float32)                           # (B, D)
    if s_on_lanes:
        q_in = jnp.zeros((B_pad, D, 1), jnp.float32).at[:B, :, 0].set(q_flat)
        q_spec = pl.BlockSpec((tb, D, 1), lambda b: (b, 0, 0))
        pk_spec = pl.BlockSpec((tb, D, S_pad), lambda b: (b, 0, 0))
        w_in = energy_w.astype(jnp.float32).reshape(D, 1)
        w_spec = pl.BlockSpec((D, 1), lambda b: (0, 0))
    else:
        q_in = jnp.zeros((B_pad, D), jnp.float32).at[:B].set(q_flat)
        q_spec = pl.BlockSpec((tb, D), lambda b: (b, 0))
        pk_spec = pl.BlockSpec((tb, S_pad, D), lambda b: (b, 0, 0))
        w_in = energy_w.astype(jnp.float32).reshape(1, D)
        w_spec = pl.BlockSpec((1, D), lambda b: (0, 0))

    out_shape = [jax.ShapeDtypeStruct((B_pad, V_pad), jnp.float32)]
    out_specs = [pl.BlockSpec((tb, V_pad), lambda b: (b, 0))]
    if return_alphas:
        out_shape.append(jax.ShapeDtypeStruct((B_pad, S_pad), jnp.float32))
        out_specs.append(pl.BlockSpec((tb, S_pad), lambda b: (b, 0)))

    est = _per_row_vmem_bytes(S_pad, D, V_pad) * tb
    vmem_limit = int(min(48 << 20, max(32 << 20, 2 * est)))   # v7x-safe (64 MiB phys)

    kernel = functools.partial(_attn_kernel, s_on_lanes=s_on_lanes,
                               tanh_dtype=tanh_dtype, return_alphas=return_alphas)

    outs = pl.pallas_call(
        kernel,
        out_shape=tuple(out_shape),
        grid_spec=pltpu.PrefetchScalarGridSpec(
            num_scalar_prefetch=0,
            grid=(B_pad // tb,),
            in_specs=[
                pl.BlockSpec((tb, 1), lambda b: (b, 0)),                 # lengths
                q_spec,                                                  # query
                pk_spec,                                                 # proj_key bf16
                pl.BlockSpec((tb, S_pad, V_pad), lambda b: (b, 0, 0)),   # value bf16
                w_spec,                                                  # energy weight
            ],
            out_specs=out_specs,
        ),
        compiler_params=pltpu.CompilerParams(
            dimension_semantics=("parallel",),
            vmem_limit_bytes=vmem_limit),
    )(lens_pad, q_in, pk_pad, v_pad, w_in)

    if not isinstance(outs, (list, tuple)):
        outs = (outs,)
    ctx = outs[0][:B, :V].reshape(B, 1, V)
    if return_alphas:
        alphas = outs[1][:B, :S].reshape(B, 1, S)
        return ctx, alphas
    return ctx


def bahdanau_attention(query, proj_key, value, lengths, energy_w, **kw):
    """Convenience composition (prepare + step). In a real decode loop, call
    prepare_attention_inputs once per sequence and bahdanau_attention_step per step."""
    pk_pad, v_pad, lens_pad, meta = prepare_attention_inputs(proj_key, value, lengths)
    return bahdanau_attention_step(query, pk_pad, v_pad, lens_pad, energy_w, meta, **kw)


def _reference(query, proj_key, value, lengths, energy_w):
    # Pure-JAX reference of the module's forward semantics on the same bf16-rounded
    # pk/value the kernel consumes (only tanh-dtype / approx-reciprocal error remains).
    S = proj_key.shape[1]
    pk_r = proj_key.astype(jnp.bfloat16).astype(jnp.float32)
    v_r = value.astype(jnp.bfloat16).astype(jnp.float32)
    pos = jnp.arange(S)[None, None, :]
    mask = pos < lengths[:, None, None]
    scores = jnp.einsum('od,bsd->bs', energy_w, jnp.tanh(query + pk_r))[:, None, :]
    scores = jnp.where(mask, scores, -jnp.inf)
    alphas = jax.nn.softmax(scores, axis=-1)
    ctx = jnp.einsum('bos,bsv->bov', alphas, v_r)
    return ctx, alphas, mask


def _run_case(key, B, S, enc_hidden, dec_out, lengths, check_ctx_only=False):
    k1, k2, k3, k4 = jax.random.split(key, 4)
    V = 2 * enc_hidden

    # key_layer: nn.Linear(2*enc_hidden, dec_out, bias=False) -> weight (D, 2H)
    key_w = jax.random.normal(k1, (dec_out, 2 * enc_hidden), jnp.float32) * 0.1
    # energy_layer: nn.Linear(dec_out, 1, bias=False) -> weight (1, D)
    energy_w = jax.random.normal(k2, (1, dec_out), jnp.float32) * 0.1
    encoder_out = jax.random.normal(k3, (B, S, 2 * enc_hidden), jnp.float32)
    query = jax.random.normal(k4, (B, 1, dec_out), jnp.float32)
    proj_key = jnp.einsum('bsh,dh->bsd', encoder_out, key_w)   # done once in forward()
    value = encoder_out
    lengths = jnp.asarray(lengths, jnp.int32)

    ctx, alphas = bahdanau_attention(query, proj_key, value, lengths, energy_w)
    jax.block_until_ready((ctx, alphas))

    ref_ctx, ref_alphas, mask = _reference(query, proj_key, value, lengths, energy_w)
    assert ctx.shape == (B, 1, V) and alphas.shape == (B, 1, S)
    assert jnp.allclose(alphas, ref_alphas, atol=2e-2, rtol=2e-2), "alphas mismatch"
    assert jnp.allclose(ctx, ref_ctx, atol=2e-2, rtol=2e-2), "context mismatch"
    # masked positions must be exactly zero weight
    assert float(jnp.max(jnp.where(mask, 0.0, alphas))) == 0.0

    if check_ctx_only:
        # context-only hot-path variant (Decoder.forward discards attn_probs)
        pk_pad, v_pad, lens_pad, meta = prepare_attention_inputs(proj_key, value, lengths)
        ctx_only = bahdanau_attention_step(query, pk_pad, v_pad, lens_pad, energy_w,
                                           meta, return_alphas=False)
        jax.block_until_ready(ctx_only)
        assert jnp.allclose(ctx_only, ref_ctx, atol=2e-2, rtol=2e-2), "ctx-only mismatch"


if __name__ == "__main__":
    root = jax.random.PRNGKey(0)
    k0, k1, k2 = jax.random.split(root, 3)

    # case 1: short sequence (S padded to 8 only, D-on-lanes layout) + ctx-only variant
    _run_case(k0, B=2, S=8, enc_hidden=16, dec_out=32, lengths=[8, 5],
              check_ctx_only=True)
    # case 2: long sequence -> S-on-lanes layout (S_pad multiple of 128, D=32 < 128)
    _run_case(k1, B=4, S=192, enc_hidden=16, dec_out=32,
              lengths=[192, 100, 50, 192])
    # case 3: bigger batch -> tb > 8 and a grid with >= 2 parallel steps
    _run_case(k2, B=32, S=8, enc_hidden=16, dec_out=32,
              lengths=[8] * 16 + [5] * 16)

    print("KERNEL_OK")
</pallas_src>

<mosaic_0001>
module attributes {stable_mosaic.version = 11 : i64} {
  func.func @_attn_kernel(%arg0: i32, %arg1: memref<8x1xi32, #tpu.memory_space<vmem>>, %arg2: memref<8x32xf32, #tpu.memory_space<vmem>>, %arg3: memref<8x8x32xbf16, #tpu.memory_space<vmem>>, %arg4: memref<8x8x128xbf16, #tpu.memory_space<vmem>>, %arg5: memref<1x32xf32, #tpu.memory_space<vmem>>, %arg6: memref<8x128xf32, #tpu.memory_space<vmem>>, %arg7: memref<8x8xf32, #tpu.memory_space<vmem>>) attributes {dimension_semantics = [#tpu.dimension_semantics<parallel>], iteration_bounds = array<i64: 1>, scalar_prefetch = 0 : i64, scratch_operands = 0 : i64, tpu.core_type = #tpu.core_type<tc>, window_params = [{transform_indices = @transform_0, window_bounds = array<i64: 8, 1>}, {transform_indices = @transform_1, window_bounds = array<i64: 8, 32>}, {transform_indices = @transform_2, window_bounds = array<i64: 8, 8, 32>}, {transform_indices = @transform_3, window_bounds = array<i64: 8, 8, 128>}, {pipeline_mode = #tpu.pipeline_mode<synchronous>, transform_indices = @transform_4, window_bounds = array<i64: 1, 32>}, {transform_indices = @transform_5, window_bounds = array<i64: 8, 128>}, {transform_indices = @transform_6, window_bounds = array<i64: 8, 8>}]} {
    %c0 = arith.constant 0 : index
    %c0_0 = arith.constant 0 : index
    %c0_1 = arith.constant 0 : index
    %0 = vector.load %arg3[%c0, %c0_0, %c0_1] : memref<8x8x32xbf16, #tpu.memory_space<vmem>>, vector<8x8x32xbf16>
    %c0_2 = arith.constant 0 : index
    %c0_3 = arith.constant 0 : index
    %c0_4 = arith.constant 0 : index
    %1 = vector.load %arg4[%c0_2, %c0_3, %c0_4] : memref<8x8x128xbf16, #tpu.memory_space<vmem>>, vector<8x8x128xbf16>
    %c0_5 = arith.constant 0 : index
    %c0_6 = arith.constant 0 : index
    %2 = vector.load %arg5[%c0_5, %c0_6] : memref<1x32xf32, #tpu.memory_space<vmem>>, vector<1x32xf32>
    %c0_7 = arith.constant 0 : index
    %c0_8 = arith.constant 0 : index
    %3 = vector.load %arg1[%c0_7, %c0_8] : memref<8x1xi32, #tpu.memory_space<vmem>>, vector<8x1xi32>
    %c0_9 = arith.constant 0 : index
    %c0_10 = arith.constant 0 : index
    %4 = vector.load %arg2[%c0_9, %c0_10] : memref<8x32xf32, #tpu.memory_space<vmem>>, vector<8x32xf32>
    %5 = vector.shape_cast %4 : vector<8x32xf32> to vector<8x1x32xf32>
    %6 = arith.extf %0 : vector<8x8x32xbf16> to vector<8x8x32xf32>
    %7 = vector.broadcast %5 : vector<8x1x32xf32> to vector<8x8x32xf32>
    %8 = arith.addf %7, %6 : vector<8x8x32xf32>
    %9 = math.tanh %8 : vector<8x8x32xf32>
    %10 = vector.shape_cast %2 : vector<1x32xf32> to vector<1x1x32xf32>
    %11 = vector.broadcast %10 : vector<1x1x32xf32> to vector<8x8x32xf32>
    %12 = arith.mulf %9, %11 : vector<8x8x32xf32>
    %cst = arith.constant dense<0.000000e+00> : vector<8x8xf32>
    %13 = vector.multi_reduction <add>, %12, %cst [2] : vector<8x8x32xf32> to vector<8x8xf32>
    %14 = tpu.iota {dimensions = array<i32: 1>} : vector<8x8xi32>
    %15 = vector.broadcast %3 : vector<8x1xi32> to vector<8x8xi32>
    %16 = arith.cmpi slt, %14, %15 : vector<8x8xi32>
    %cst_11 = arith.constant -1.000000e+30 : f32
    %17 = vector.broadcast %cst_11 : f32 to vector<8x8xf32>
    %18 = arith.select %16, %13, %17 : vector<8x8xi1>, vector<8x8xf32>
    %cst_12 = arith.constant dense<0xFF800000> : vector<8xf32>
    %19 = vector.multi_reduction <maximumf>, %18, %cst_12 [1] : vector<8x8xf32> to vector<8xf32>
    %20 = vector.shape_cast %19 : vector<8xf32> to vector<8x1xf32>
    %21 = vector.broadcast %20 : vector<8x1xf32> to vector<8x8xf32>
    %22 = arith.subf %18, %21 : vector<8x8xf32>
    %23 = math.exp %22 : vector<8x8xf32>
    %cst_13 = arith.constant dense<0.000000e+00> : vector<8xf32>
    %24 = vector.multi_reduction <add>, %23, %cst_13 [1] : vector<8x8xf32> to vector<8xf32>
    %25 = vector.shape_cast %24 : vector<8xf32> to vector<8x1xf32>
    %26 = tpu.reciprocal %25 {approx = true} : vector<8x1xf32> -> vector<8x1xf32>
    %27 = vector.broadcast %26 : vector<8x1xf32> to vector<8x8xf32>
    %28 = arith.mulf %23, %27 : vector<8x8xf32>
    %29 = vector.shape_cast %28 : vector<8x8xf32> to vector<8x8x1xf32>
    %30 = arith.extf %1 : vector<8x8x128xbf16> to vector<8x8x128xf32>
    %31 = vector.broadcast %29 : vector<8x8x1xf32> to vector<8x8x128xf32>
    %32 = arith.mulf %31, %30 : vector<8x8x128xf32>
    %cst_14 = arith.constant dense<0.000000e+00> : vector<8x128xf32>
    %33 = vector.multi_reduction <add>, %32, %cst_14 [1] : vector<8x8x128xf32> to vector<8x128xf32>
    %c0_15 = arith.constant 0 : index
    %c0_16 = arith.constant 0 : index
    %34 = vector.load %arg6[%c0_15, %c0_16] : memref<8x128xf32, #tpu.memory_space<vmem>>, vector<8x128xf32>
    tpu.vector_store %arg6[%c0_15, %c0_16], %33 {strides = array<i32>} : memref<8x128xf32, #tpu.memory_space<vmem>>, vector<8x128xf32>,
    %c0_17 = arith.constant 0 : index
    %c0_18 = arith.constant 0 : index
    %35 = vector.load %arg7[%c0_17, %c0_18] : memref<8x8xf32, #tpu.memory_space<vmem>>, vector<8x8xf32>
    tpu.vector_store %arg7[%c0_17, %c0_18], %28 {strides = array<i32>} : memref<8x8xf32, #tpu.memory_space<vmem>>, vector<8x8xf32>,
    return
  }
  func.func @transform_0(%arg0: i32) -> (i32, i32) {
    %c0_i32 = arith.constant 0 : i32
    %c0_i32_0 = arith.constant 0 : i32
    return %arg0, %c0_i32 : i32, i32
  }
  func.func @transform_1(%arg0: i32) -> (i32, i32) {
    %c0_i32 = arith.constant 0 : i32
    %c0_i32_0 = arith.constant 0 : i32
    return %arg0, %c0_i32 : i32, i32
  }
  func.func @transform_2(%arg0: i32) -> (i32, i32, i32) {
    %c0_i32 = arith.constant 0 : i32
    %c0_i32_0 = arith.constant 0 : i32
    %c0_i32_1 = arith.constant 0 : i32
    return %arg0, %c0_i32, %c0_i32_0 : i32, i32, i32
  }
  func.func @transform_3(%arg0: i32) -> (i32, i32, i32) {
    %c0_i32 = arith.constant 0 : i32
    %c0_i32_0 = arith.constant 0 : i32
    %c0_i32_1 = arith.constant 0 : i32
    return %arg0, %c0_i32, %c0_i32_0 : i32, i32, i32
  }
  func.func @transform_4(%arg0: i32) -> (i32, i32) {
    %c0_i32 = arith.constant 0 : i32
    %c0_i32_0 = arith.constant 0 : i32
    %c0_i32_1 = arith.constant 0 : i32
    return %c0_i32, %c0_i32_0 : i32, i32
  }
  func.func @transform_5(%arg0: i32) -> (i32, i32) {
    %c0_i32 = arith.constant 0 : i32
    %c0_i32_0 = arith.constant 0 : i32
    return %arg0, %c0_i32 : i32, i32
  }
  func.func @transform_6(%arg0: i32) -> (i32, i32) {
    %c0_i32 = arith.constant 0 : i32
    %c0_i32_0 = arith.constant 0 : i32
    return %arg0, %c0_i32 : i32, i32
  }
}

</mosaic_0001>

<bundles_post_ra>
// kernel: tpu_custom_call.1
= control target key start
LH: loop header
LB: loop body
LE: loop exit
PB: predicated region body
PF: predicated region fallthrough
CT: control target
= control target key end

     0   :  { %12 = vsyncpa [#allocation3], 0  ;;  %s737_s0 = inlined_call_operand.vmem [shape: s32[8,1], index: 0, kind: input, shape index: {}]   ;;  %s738_s1 = inlined_call_operand.vmem [shape: f32[8,32], index: 1, kind: input, shape index: {}]   ;;  %s739_s2 = inlined_call_operand.hbm [shape: bf16[8,8,32], index: 2, kind: input, shape index: {}]   ;;  %s740_s3 = inlined_call_operand.hbm [shape: bf16[8,8,128], index: 3, kind: input, shape index: {}]   ;;  %s741_s4 = inlined_call_operand.vmem [shape: f32[1,32], index: 4, kind: input, shape index: {}]   ;;  %s742_s5 = inlined_call_operand.hbm [shape: f32[8,128], index: 5, kind: output, shape index: {0}]   ;;  %s743_s6 = inlined_call_operand.hbm [shape: f32[8,8], index: 6, kind: output, shape index: {1}]  }
   0x1   :  { %13 = vsyncpa [#allocation6], 0 }
   0x2   :  { %14 = vsyncpa [#allocation4], 0 }
   0x3   :  { %15 = vsyncpa [#allocation9], 0  ;;  %s623_s21 = smov [#allocation2]  }
   0x4   :  { %s25_s22 = sshll.u32 %s623_s21, 4  ;;  %s26_s22 = int_to_ptr.vmem [resolvable:$true] %s25_s22 }
   0x5   :  { %s543_s23 = scalar_lea.vmem %s26_s22, 512  ;;  %p548_p1 = scmp.lt.s32.totalorder %s26_s22, %s26_s22 }
   0x6   :  { %p544_p0 = scmp.ne.s32.totalorder %s26_s22, %s543_s23  ;;  %p549_p2 = scmp.lt.s32.totalorder %s543_s23, %s543_s23 }
   0x8   :  { %p550_p3 = por %p549_p2, %p548_p1 }
   0xa   :  { %p551_p4 = pnand %p550_p3, %p544_p0 }
   0xc   :  { %554 = shalt.err (!%p551_p4)
}
   0xd   :  { %s624_s24 = smov 64   ;;  %s625_s25 = smov 4  }
   0xe   :  { %31 = dma.hbm_to_vmem [thread:$0]  %s739_s2, 512, %s26_s22, [#allocation3], %s624_s24, %s624_s24, %s625_s25  }
   0xf   :  { %s626_s28 = smov [#allocation5]  }
  0x10   :  { %s37_s29 = sshll.u32 %s626_s28, 4  ;;  %s38_s29 = int_to_ptr.vmem [resolvable:$true] %s37_s29 }
  0x11   :  { %s563_s30 = scalar_lea.vmem %s38_s29, 512  ;;  %p568_p6 = scmp.lt.s32.totalorder %s38_s29, %s38_s29 }
  0x12   :  { %p564_p5 = scmp.ne.s32.totalorder %s38_s29, %s563_s30  ;;  %p569_p7 = scmp.lt.s32.totalorder %s563_s30, %s563_s30 }
  0x14   :  { %p570_p8 = por %p569_p7, %p568_p6 }
  0x16   :  { %p571_p9 = pnand %p570_p8, %p564_p5 }
  0x18   :  { %574 = shalt.err (!%p571_p9)
}
  0x19   :  { %43 = dma.hbm_to_vmem [thread:$0]  %s740_s3, 512, %s38_s29, [#allocation6], %s624_s24, %s624_s24, %s625_s25  }
  0x1a   :  { %615 = dma.done.wait [#allocation3], 512  }
  0x1b   :  { %616 = vsyncadd [#allocation3], 4294966784 }
  0x1c   :  { %617 = dma.done.wait [#allocation6], 512  }
  0x1d   :  { %618 = vsyncadd [#allocation6], 4294966784  ;;  %v76_v0 = vlaneseq  ;;  %v627_v1 = vmov 1966171168   ;;  %v628_v3 = vmov 0   ;;  %v468_v7 = vld [vmem:[#allocation2] sm:$0xff]  }
  0x1e   :  { %v74_v2 = vunpack.c.l.s4 %v627_v1  ;;  %513 = vset.pattern.permute.xlu0 %v628_v3  ;;  %v70_v8 = vld [vmem:[%s738_s1] sm:$0xff]  ;;  %v499_v12 = vld [vmem:[#allocation2 + $0x8] sm:$0xff]   ;;  %v469_v13 = vunpack.c.l.bf16 %v468_v7  ;;  %v500_v16 = vld [vmem:[#allocation2 + $0x10] sm:$0xff]   ;;  %v470_v20 = vunpack.c.h.bf16 %v468_v7  ;;  %vm199_vm0 = vcmask 261120  }
  0x1f   :  { %v673_v4 = vshrl.u32 %v76_v0, 7  ;;  %v72_v9 = vcombine.high %v70_v8, %v70_v8  ;;  %v501_v18 = vld [vmem:[#allocation2 + $0x18] sm:$0xff]   ;;  %v473_v19 = vunpack.c.l.bf16 %v499_v12  ;;  %v474_v21 = vunpack.c.h.bf16 %v499_v12  ;;  %v466_v50 = vld [vmem:[%s741_s4] ss:$0 sm:$0xff] }
  0x20   :  { %v75_v5 = vunpack.c.0.s8 %v74_v2  ;;  %v477_v26 = vunpack.c.l.bf16 %v500_v16  ;;  %v478_v27 = vunpack.c.h.bf16 %v500_v16  ;;  %v481_v29 = vunpack.c.l.bf16 %v501_v18 }
  0x21   :  { %v680_v11 = vsub.s32 0, %v673_v4  ;;  %v482_v37 = vunpack.c.h.bf16 %v501_v18  ;;  %vm270_vm1 = vcmask 1041409   ;;  %vm272_vm2 = vcmask 1042434  }
  0x22   :  { %v78_v6 = vsub.s32 %v75_v5, %v673_v4  ;;  %vm274_vm3 = vcmask 1043459   ;;  %vm276_vm4 = vcmask 1044484   ;;  %vm278_vm5 = vcmask 1045509  }
  0x23   :  { %vm280_vm6 = vcmask 1046534   ;;  %vm282_vm7 = vcmask 1047559   ;;  %vm286_vm8 = vcmask 64512  }
  0x24   :  { %v79_v10 = vrot.slane %v70_v8, %v78_v6  ;;  %v86_v17 = vrot.slane %v72_v9, %v78_v6 }
  0x26   :  { %v95_v14 = vrot.slane %v79_v10, %v78_v6  ;;  %v87_v15 = vcombine.high %v79_v10, %v79_v10  ;;  %v102_v25 = vrot.slane %v86_v17, %v78_v6  ;;  %v88_v28 = vcombine.high %v86_v17, %v86_v17 }
  0x28   :  { %v132_v22 = vrot.slane %v95_v14, %v680_v11  ;;  %v117_v23 = vcombine.high %v95_v14, %v95_v14  ;;  %v109_v24 = vrot.slane %v87_v15, %v78_v6  ;;  %v148_v34 = vrot.slane %v102_v25, %v680_v11  ;;  %v69_v14 = vld [vmem:[%s737_s0] sm:$0xff]  ;;  %s629_s0 = smov [#allocation8]  }
  0x29   :  { %v116_v35 = vrot.slane %v88_v28, %v78_v6  ;;  %v118_v36 = vcombine.high %v102_v25, %v102_v25  ;;  %v225_v15 = vand.u32 127, %v76_v0  ;;  %s452_s11 = sshll.u32 %s629_s0, 4  ;;  %s453_s11 = int_to_ptr.vmem [resolvable:$true] %s452_s11 }
  0x2a   :  { %v169_v30 = vadd.f32 %v469_v13, %v132_v22  ;;  %v140_v31 = vrot.slane %v117_v23, %v680_v11  ;;  %v136_v32 = vrot.slane %v109_v24, %v680_v11  ;;  %v119_v33 = vcombine.high %v109_v24, %v109_v24  ;;  %s575_s12 = scalar_lea.vmem %s453_s11, 128  ;;  %p580_p11 = scmp.lt.s32.totalorder %s453_s11, %s453_s11 }
  0x2b   :  { %v173_v41 = vadd.f32 %v477_v26, %v148_v34  ;;  %v152_v42 = vrot.slane %v116_v35, %v680_v11  ;;  %v156_v43 = vrot.slane %v118_v36, %v680_v11  ;;  %v120_v44 = vcombine.high %v116_v35, %v116_v35  ;;  %p576_p10 = scmp.ne.s32.totalorder %s453_s11, %s575_s12  ;;  %p581_p12 = scmp.lt.s32.totalorder %s575_s12, %s575_s12 }
  0x2c   :  { %515 = vtanh.f32 %v169_v30  ;;  %v171_v38 = vadd.f32 %v473_v19, %v140_v31  ;;  %v170_v39 = vadd.f32 %v470_v20, %v136_v32  ;;  %v144_v40 = vrot.slane %v119_v33, %v680_v11 }
  0x2d   :  { %v174_v46 = vadd.f32 %v478_v27, %v152_v42  ;;  %v175_v47 = vadd.f32 %v481_v29, %v156_v43  ;;  %v160_v48 = vrot.slane %v120_v44, %v680_v11  ;;  %v240_v17 = vsub.s32 %v225_v15, %v673_v4  ;;  %p582_p13 = por %p581_p12, %p580_p11 }
  0x2e   :  { %517 = vtanh.f32 %v171_v38  ;;  %v172_v45 = vadd.f32 %v474_v21, %v144_v40 }
  0x2f   :  { %519 = vtanh.f32 %v170_v39  ;;  %v176_v49 = vadd.f32 %v482_v37, %v160_v48  ;;  %v342_v48 = vsub.s32 6, %v673_v4  ;;  %p583_p0 = pnand %p582_p13, %p576_p10 }
  0x30   :  { %521 = vtanh.f32 %v172_v45 }
  0x31   :  { %523 = vtanh.f32 %v173_v41 }
  0x32   :  { %525 = vtanh.f32 %v174_v46 }
  0x33   :  { %527 = vtanh.f32 %v175_v47 }
  0x34   :  { %529 = vtanh.f32 %v176_v49 }
  0x39   :  { %v516_v51 = vpop.eup %515 }
  0x3a   :  { %v191_v52 = vmul.f32 %v516_v51, %v466_v50 }
  0x3b   :  { %v518_v53 = vpop.eup %517 }
  0x3c   :  { %v520_v54 = vpop.eup %519  ;;  %v200_v55 = vsel %vm199_vm0, %v191_v52, 0.0  ;;  %v193_v56 = vmul.f32 %v518_v53, %v466_v50  ;;  %v307_v53 = vsub.s32 1, %v673_v4 }
  0x3d   :  { %v522_v57 = vpop.eup %521  ;;  %201 = vadd.xlane.f32.xlu0 %v200_v55  ;;  %v192_v58 = vmul.f32 %v520_v54, %v466_v50  ;;  %v314_v55 = vsub.s32 2, %v673_v4 }
  0x3e   :  { %v524_v59 = vpop.eup %523  ;;  %v206_v60 = vsel %vm199_vm0, %v193_v56, 0.0  ;;  %v194_v61 = vmul.f32 %v522_v57, %v466_v50  ;;  %v321_v57 = vsub.s32 3, %v673_v4 }
  0x3f   :  { %v526_v62 = vpop.eup %525  ;;  %207 = vadd.xlane.f32.xlu1 %v206_v60  ;;  %v203_v63 = vsel %vm199_vm0, %v192_v58, 0.0  ;;  %v195_v1 = vmul.f32 %v524_v59, %v466_v50  ;;  %v328_v59 = vsub.s32 4, %v673_v4 }
  0x40   :  { %v528_v2 = vpop.eup %527  ;;  %v209_v3 = vsel %vm199_vm0, %v194_v61, 0.0  ;;  %v196_v5 = vmul.f32 %v526_v62, %v466_v50  ;;  %v335_v61 = vsub.s32 5, %v673_v4  ;;  %v349_v62 = vsub.s32 7, %v673_v4 }
  0x41   :  { %v530_v6 = vpop.eup %529  ;;  %204 = vadd.xlane.f32.xlu0 %v203_v63  ;;  %v212_v7 = vsel %vm199_vm0, %v195_v1, 0.0  ;;  %v197_v8 = vmul.f32 %v528_v2, %v466_v50 }
  0x42   :  { %v215_v9 = vsel %vm199_vm0, %v196_v5, 0.0  ;;  %v198_v10 = vmul.f32 %v530_v6, %v466_v50 }
  0x43   :  { %210 = vadd.xlane.f32.xlu1 %v209_v3  ;;  %v218_v12 = vsel %vm199_vm0, %v197_v8, 0.0 }
  0x44   :  { %v221_v13 = vsel %vm199_vm0, %v198_v10, 0.0 }
  0x45   :  { %213 = vadd.xlane.f32.xlu0 %v212_v7 }
  0x47   :  { %216 = vadd.xlane.f32.xlu1 %v215_v9 }
  0x49   :  { %219 = vadd.xlane.f32.xlu0 %v218_v12 }
  0x4b   :  { %222 = vadd.xlane.f32.xlu1 %v221_v13 }
  0x5f   :  { %227 = vperm.xlu0 %513, %v69_v14  }
  0xc6   :  { %v202_v16 = vpop.xlane.xlu0 %201 }
  0xc7   :  { %v241_v21 = vrot.slane %v202_v16, %v240_v17 }
  0xc8   :  { %v208_v18 = vpop.xlane.xlu1 %207 }
  0xc9   :  { %v249_v19 = vrot.slane %v208_v18, %v240_v17 }
  0xca   :  { %v205_v20 = vpop.xlane.xlu0 %204 }
  0xcb   :  { %v245_v22 = vrot.slane %v205_v20, %v240_v17 }
  0xcc   :  { %v211_v23 = vpop.xlane.xlu1 %210 }
  0xcd   :  { %v271_v24 = vsel %vm270_vm1, %v245_v22, %v241_v21  ;;  %v253_v25 = vrot.slane %v211_v23, %v240_v17 }
  0xce   :  { %v273_v26 = vsel %vm272_vm2, %v249_v19, %v271_v24  ;;  %v214_v27 = vpop.xlane.xlu0 %213 }
  0xcf   :  { %v275_v0 = vsel %vm274_vm3, %v253_v25, %v273_v26  ;;  %v257_v28 = vrot.slane %v214_v27, %v240_v17 }
  0xd0   :  { %v217_v29 = vpop.xlane.xlu1 %216 }
  0xd1   :  { %v261_v30 = vrot.slane %v217_v29, %v240_v17  ;;  %v277_v31 = vsel %vm276_vm4, %v257_v28, %v275_v0 }
  0xd2   :  { %v220_v32 = vpop.xlane.xlu0 %219 }
  0xd3   :  { %v265_v33 = vrot.slane %v220_v32, %v240_v17  ;;  %v279_v35 = vsel %vm278_vm5, %v261_v30, %v277_v31 }
  0xd4   :  { %v223_v34 = vpop.xlane.xlu1 %222 }
  0xd5   :  { %v269_v36 = vrot.slane %v223_v34, %v240_v17  ;;  %v281_v37 = vsel %vm280_vm6, %v265_v33, %v279_v35 }
  0xd7   :  { %v283_v39 = vsel %vm282_vm7, %v269_v36, %v281_v37 }
  0xda   :  { %v228_v38 = vpop.permute.xlu0 %227 }
  0xdb   :  { %vm229_vm9 = vcmp.lt.s32.totalorder %v225_v15, %v228_v38 }
  0xdc   :  { %v285_v40 = vsel %vm229_vm9, %v283_v39, -1e+30 }
  0xdd   :  { %v287_v41 = vsel %vm286_vm8, %v285_v40, -inf }
  0xde   :  { %288 = vmax.xlane.f32.xlu1 %v287_v41 }
 0x167   :  { %v289_v42 = vpop.xlane.xlu1 %288 }
 0x168   :  { %v290_v43 = vsub.f32 %v285_v40, %v289_v42 }
 0x16a   :  { %v291_v44 = vmul.f32 1.442695, %v290_v43 }
 0x16c   :  { %531 = vpow2.f32 %v291_v44 }
 0x179   :  { %v532_v45 = vpop.eup %531 }
 0x17a   :  { %v293_v46 = vsel %vm286_vm8, %v532_v45, 0.0 }
 0x17b   :  { %294 = vadd.xlane.f32.xlu1 %v293_v46 }
 0x204   :  { %v295_v47 = vpop.xlane.xlu1 %294 }
 0x205   :  { %533 = vrcp.f32 %v295_v47 }
 0x212   :  { %v534_v49 = vpop.eup %533 }
 0x213   :  { %v297_v50 = vmul.f32 %v534_v49, %v532_v45 }
 0x215   :  { %435 = vst.msk [vmem:[#allocation8] sm:$0xff] %vm286_vm8, %v297_v50  ;;  %v343_v51 = vrot.slane %v297_v50, %v342_v48  ;;  %v301_v52 = vrot.slane %v297_v50, %v680_v11  ;;  %v308_v54 = vrot.slane %v297_v50, %v307_v53  ;;  %v315_v56 = vrot.slane %v297_v50, %v314_v55 }
 0x216   :  { %v322_v58 = vrot.slane %v297_v50, %v321_v57  ;;  %v329_v60 = vrot.slane %v297_v50, %v328_v59  ;;  %v336_v11 = vrot.slane %v297_v50, %v335_v61  ;;  %v350_v63 = vrot.slane %v297_v50, %v349_v62 }
 0x217   :  { %345 = vbcast.lane.b32.xlu0 %v343_v51, 256  ;;  %303 = vbcast.lane.b32.xlu1 %v301_v52, 256 }
 0x21b   :  { %310 = vbcast.lane.b32.xlu1 %v308_v54, 256 }
 0x21f   :  { %317 = vbcast.lane.b32.xlu1 %v315_v56, 256 }
 0x223   :  { %324 = vbcast.lane.b32.xlu1 %v322_v58, 256 }
 0x227   :  { %331 = vbcast.lane.b32.xlu1 %v329_v60, 256 }
 0x22b   :  { %338 = vbcast.lane.b32.xlu1 %v336_v11, 256 }
 0x22f   :  { %352 = vbcast.lane.b32.xlu1 %v350_v63, 256 }
 0x230   :  { %586 = shalt.err (!%p583_p0)
}
 0x231   :  { %455 = dma.vmem_to_hbm [thread:$0]  %s453_s11, 128, %s743_s6, [#allocation9]   ;;  %v484_v1 = vld [vmem:[#allocation5] sm:$0xff]   ;;  %v502_v5 = vld [vmem:[#allocation5 + $0x8] sm:$0xff]   ;;  %v504_v8 = vld [vmem:[#allocation5 + $0x18] sm:$0xff]  }
 0x232   :  { %v485_v2 = vunpack.c.l.bf16 %v484_v1  ;;  %v486_v3 = vunpack.c.h.bf16 %v484_v1  ;;  %v489_v10 = vunpack.c.l.bf16 %v502_v5  ;;  %v497_v13 = vunpack.c.l.bf16 %v504_v8  ;;  %v503_v19 = vld [vmem:[#allocation5 + $0x10] sm:$0xff]   ;;  %s630_s6 = smov [#allocation7]  }
 0x233   :  { %v490_v18 = vunpack.c.h.bf16 %v502_v5  ;;  %v493_v26 = vunpack.c.l.bf16 %v503_v19  ;;  %v494_v34 = vunpack.c.h.bf16 %v503_v19  ;;  %v498_v45 = vunpack.c.h.bf16 %v504_v8  ;;  %s442_s15 = sshll.u32 %s630_s6, 4  ;;  %s443_s15 = int_to_ptr.vmem [resolvable:$true] %s442_s15 }
 0x234   :  { %s595_s16 = scalar_lea.vmem %s443_s15, 128  ;;  %p600_p2 = scmp.lt.s32.totalorder %s443_s15, %s443_s15 }
 0x235   :  { %p596_p1 = scmp.ne.s32.totalorder %s443_s15, %s595_s16  ;;  %p601_p3 = scmp.lt.s32.totalorder %s595_s16, %s595_s16 }
 0x237   :  { %p602_p4 = por %p601_p3, %p600_p2 }
 0x239   :  { %p603_p5 = pnand %p602_p4, %p596_p1 }
 0x289   :  { %v304_v4 = vpop.permute.xlu1 %303  ;;  %v346_v16 = vpop.permute.xlu0 %345 }
 0x28a   :  { %v362_v6 = vmul.f32 %v485_v2, %v304_v4  ;;  %v368_v22 = vmul.f32 %v497_v13, %v346_v16 }
 0x28c   :  { %v370_v14 = vrot.slane %v362_v6, 4  ;;  %v406_v28 = vrot.slane %v368_v22, 4 }
 0x28d   :  { %v311_v7 = vpop.permute.xlu1 %310 }
 0x28e   :  { %v363_v9 = vmul.f32 %v486_v3, %v311_v7  ;;  %v371_v23 = vadd.f32 %v370_v14, %v362_v6  ;;  %v407_v38 = vadd.f32 %v406_v28, %v368_v22 }
 0x290   :  { %v376_v12 = vrot.slane %v363_v9, 4  ;;  %v372_v29 = vrot.slane %v371_v23, 2  ;;  %v408_v50 = vrot.slane %v407_v38, 2 }
 0x291   :  { %v318_v15 = vpop.permute.xlu1 %317 }
 0x292   :  { %v364_v17 = vmul.f32 %v489_v10, %v318_v15  ;;  %v377_v20 = vadd.f32 %v376_v12, %v363_v9  ;;  %v373_v39 = vadd.f32 %v372_v29, %v371_v23  ;;  %v409_v11 = vadd.f32 %v408_v50, %v407_v38 }
 0x294   :  { %v382_v21 = vrot.slane %v364_v17, 4  ;;  %v378_v0 = vrot.slane %v377_v20, 2  ;;  %v374_v51 = vrot.slane %v373_v39, 1  ;;  %v410_v8 = vrot.slane %v409_v11, 1 }
 0x295   :  { %v325_v24 = vpop.permute.xlu1 %324 }
 0x296   :  { %v383_v25 = vadd.f32 %v382_v21, %v364_v17  ;;  %v365_v27 = vmul.f32 %v490_v18, %v325_v24  ;;  %v379_v36 = vadd.f32 %v378_v0, %v377_v20  ;;  %v375_v63 = vadd.f32 %v374_v51, %v373_v39 }
 0x297   :  { %v411_v17 = vadd.f32 %v410_v8, %v409_v11 }
 0x298   :  { %v384_v30 = vrot.slane %v383_v25, 2  ;;  %v388_v31 = vrot.slane %v365_v27, 4  ;;  %v380_v47 = vrot.slane %v379_v36, 1 }
 0x299   :  { %v332_v32 = vpop.permute.xlu1 %331 }
 0x29a   :  { %v366_v33 = vmul.f32 %v493_v26, %v332_v32  ;;  %v389_v35 = vadd.f32 %v388_v31, %v365_v27  ;;  %v385_v40 = vadd.f32 %v384_v30, %v383_v25  ;;  %v381_v58 = vadd.f32 %v380_v47, %v379_v36 }
 0x29c   :  { %v394_v37 = vrot.slane %v366_v33, 4  ;;  %v390_v41 = vrot.slane %v389_v35, 2  ;;  %v386_v52 = vrot.slane %v385_v40, 1  ;;  %v426_v5 = vsel %vm270_vm1, %v381_v58, %v375_v63 }
 0x29d   :  { %v339_v42 = vpop.permute.xlu1 %338 }
 0x29e   :  { %v395_v43 = vadd.f32 %v394_v37, %v366_v33  ;;  %v367_v44 = vmul.f32 %v494_v34, %v339_v42  ;;  %v391_v46 = vadd.f32 %v390_v41, %v389_v35  ;;  %v387_v62 = vadd.f32 %v386_v52, %v385_v40 }
 0x2a0   :  { %v396_v48 = vrot.slane %v395_v43, 2  ;;  %v400_v49 = vrot.slane %v367_v44, 4  ;;  %v392_v54 = vrot.slane %v391_v46, 1  ;;  %v427_v9 = vsel %vm272_vm2, %v387_v62, %v426_v5 }
 0x2a1   :  { %v353_v53 = vpop.permute.xlu1 %352 }
 0x2a2   :  { %v397_v55 = vadd.f32 %v396_v48, %v395_v43  ;;  %v401_v56 = vadd.f32 %v400_v49, %v367_v44  ;;  %v369_v57 = vmul.f32 %v498_v45, %v353_v53  ;;  %v393_v1 = vadd.f32 %v392_v54, %v391_v46 }
 0x2a4   :  { %v398_v59 = vrot.slane %v397_v55, 1  ;;  %v402_v60 = vrot.slane %v401_v56, 2  ;;  %v412_v61 = vrot.slane %v369_v57, 4  ;;  %v428_v10 = vsel %vm274_vm3, %v393_v1, %v427_v9 }
 0x2a6   :  { %v403_v2 = vadd.f32 %v402_v60, %v401_v56  ;;  %v413_v4 = vadd.f32 %v412_v61, %v369_v57  ;;  %v399_v3 = vadd.f32 %v398_v59, %v397_v55 }
 0x2a8   :  { %v404_v6 = vrot.slane %v403_v2, 1  ;;  %v414_v7 = vrot.slane %v413_v4, 2  ;;  %v429_v14 = vsel %vm276_vm4, %v399_v3, %v428_v10 }
 0x2aa   :  { %v405_v12 = vadd.f32 %v404_v6, %v403_v2  ;;  %v415_v13 = vadd.f32 %v414_v7, %v413_v4 }
 0x2ac   :  { %v416_v15 = vrot.slane %v415_v13, 1  ;;  %v430_v16 = vsel %vm278_vm5, %v405_v12, %v429_v14 }
 0x2ad   :  { %v431_v19 = vsel %vm280_vm6, %v411_v17, %v430_v16 }
 0x2ae   :  { %v417_v18 = vadd.f32 %v416_v15, %v415_v13 }
 0x2b0   :  { %v432_v20 = vsel %vm282_vm7, %v417_v18, %v431_v19 }
 0x2b1   :  { %434 = vst [vmem:[#allocation7] sm:$0xff] %v432_v20 }
 0x2b2   :  { %606 = shalt.err (!%p603_p5)
}
 0x2b3   :  { %445 = dma.vmem_to_hbm [thread:$0]  %s443_s15, 128, %s742_s5, [#allocation4]  }
 0x2b4   :  { %619 = dma.done.wait [#allocation4], 128  }
 0x2b5   :  { %620 = vsyncadd [#allocation4], 4294967168 }
 0x2b6   :  { %621 = dma.done.wait [#allocation9], 128  }
 0x2b7   :  { %622 = vsyncadd [#allocation9], 4294967168 }
 0x2b8   :  { %462 = vsyncpa [#allocation3], 1 }
 0x2b9   :  { %463 = vsyncpa [#allocation6], 1 }
 0x2ba   :  { %464 = vsyncpa [#allocation4], 1 }
 0x2bb   :  { %465 = vsyncpa [#allocation9], 1 }

</bundles_post_ra>
